<compile_context>
chip_gen: v7x
topology: tpu7x:2x2x1
jax: 0.10.0
libtpu: 0.0.40
codegen_flags: <defaults>
</compile_context>

<pallas_src>
import math

import jax
import jax.numpy as jnp
from jax.experimental import pallas as pl
from jax.experimental.pallas import tpu as pltpu


def _pe_add_kernel(x_ref, pe_ref, o_ref):
    # x_ref / o_ref: (bT, tR, L) activation tile; pe_ref: (tR, L) shared PE
    # tile, broadcast over the folded batch dim. Mixed dtypes promote on the
    # VPU (free in a mem-bound kernel) and are cast back to the output dtype.
    o_ref[...] = (x_ref[...] + pe_ref[...][None, :, :]).astype(o_ref.dtype)


def make_positional_encoding_table(d_model: int, max_len: int = 5000,
                                   dtype=jnp.float32) -> jnp.ndarray:
    """Deterministic sinusoidal table, shape (max_len, d_model).

    Built in float32 and cast once at construction time (so bf16 models get a
    bf16 PE stream with zero per-call cost). Same caveat as the PyTorch
    original: assumes even d_model.
    """
    position = jnp.arange(0, max_len, dtype=jnp.float32)[:, None]          # (max_len, 1)
    div_term = jnp.exp(
        jnp.arange(0, d_model, 2, dtype=jnp.float32) * (-math.log(10000.0) / d_model)
    )                                                                       # (d_model//2,)
    angles = position * div_term                                            # (max_len, d_model//2)
    pe = jnp.zeros((max_len, d_model), dtype=jnp.float32)
    pe = pe.at[:, 0::2].set(jnp.sin(angles))
    pe = pe.at[:, 1::2].set(jnp.cos(angles))
    return pe.astype(dtype)


def positional_encoding(x: jnp.ndarray, pe: jnp.ndarray, *,
                        tile_bytes: int = 2 * 1024 * 1024,
                        donate_x: bool = False) -> jnp.ndarray:
    """x: (B, S, D); pe: (max_len, D). Returns (x + pe[None, :S, :]).astype(x.dtype)."""
    B, S, D = x.shape
    pe_slice = pe[:S, :]   # no per-call dtype cast (cast happens in-kernel if needed)

    # --- layout plumbing (wrapper-only): lane-dense last dim, rows >= 8 ------
    # Flatten the per-batch (S, D) slab and refold it so the last dim is a
    # multiple of 128 AND the resulting rows fill full (8,128) vregs where
    # possible -> unmasked vector stores. x and pe refold identically, so the
    # elementwise correspondence is preserved.
    feat = S * D
    itemsize = jnp.dtype(x.dtype).itemsize
    lane = None
    largest_div = None
    for cand in (1024, 512, 256, 128):
        if feat % cand == 0:
            if largest_div is None:
                largest_div = cand
            if feat // cand >= 8:          # full sublane occupancy preferred
                lane = cand
                break
    if lane is None:
        lane = largest_div                  # lane-dense but rows < 8
    if lane is not None:
        rows = feat // lane
        x2 = x.reshape(B, rows, lane)
        pe2 = pe_slice.reshape(rows, lane)
    else:
        # TODO(synk): S*D not a multiple of 128 -> masked partial stores
        # (correct, ~4.5x slower on the store side). If non-128-multiple
        # d_model shows up in production, pad d_model / the PE table once at
        # the model level instead of paying this every forward pass.
        rows, lane = S, D
        x2, pe2 = x, pe_slice

    # --- block sizing: ~tile_bytes of activations per grid step --------------
    slab_bytes = rows * lane * itemsize            # one batch's refolded slab
    if slab_bytes >= tile_bytes:
        # Large per-batch slab: tile over rows, one batch per step.
        bT = 1
        rows_target = max(8, tile_bytes // (lane * itemsize))
        if rows <= rows_target:
            t_rows = rows                           # full extent (always legal)
        else:
            t_rows = max(8, (rows_target // 8) * 8)  # sublane multiple of 8
    else:
        # Small per-batch slab: fold batches so each step still moves ~tile_bytes.
        t_rows = rows
        bT = min(B, max(1, tile_bytes // max(1, slab_bytes)))

    # B innermost: the PE tile's block index (t, 0) is constant across the
    # inner axis, so it is fetched once per row-tile and reused for every
    # batch block.
    grid = (pl.cdiv(rows, t_rows), pl.cdiv(B, bT))

    cost = pl.CostEstimate(
        flops=B * S * D,
        transcendentals=0,
        bytes_accessed=2 * x.nbytes + pe2.nbytes,
    )

    out2 = pl.pallas_call(
        _pe_add_kernel,
        out_shape=jax.ShapeDtypeStruct(x2.shape, x.dtype),
        grid_spec=pltpu.PrefetchScalarGridSpec(
            num_scalar_prefetch=0,
            grid=grid,
            in_specs=[
                pl.BlockSpec((bT, t_rows, lane), lambda t, b: (b, t, 0)),  # activations
                pl.BlockSpec((t_rows, lane), lambda t, b: (t, 0)),         # shared PE tile
            ],
            out_specs=pl.BlockSpec((bT, t_rows, lane), lambda t, b: (b, t, 0)),
        ),
        compiler_params=pltpu.CompilerParams(
            # Independent output blocks per step: both axes shardable across
            # TensorCores (v7x megacore). 32 MiB scoped VMEM is v7x-safe
            # (64 MiB physical) and leaves headroom on v5e/v6e (128 MiB).
            dimension_semantics=("parallel", "parallel"),
            vmem_limit_bytes=32 * 1024 * 1024,
        ),
        cost_estimate=cost,
        # In-place alias only when the caller actually donates x; otherwise a
        # hidden defensive copy would add an un-hidden HBM pass.
        input_output_aliases={0: 0} if donate_x else {},
    )(x2, pe2)

    return out2.reshape(B, S, D)


if __name__ == "__main__":
    key = jax.random.PRNGKey(0)

    # (B, S, D), x dtype, pe dtype, extra kwargs
    cases = [
        ((2, 8, 32),  jnp.float32,  jnp.float32,  {}),                      # tiny slab -> batch folding
        ((2, 16, 128), jnp.float32,  jnp.float32,  {}),                      # feat=2048 -> lane=256, rows=8
        ((3, 16, 128), jnp.bfloat16, jnp.float32,  {}),                      # mixed-dtype add, B edge block
        ((2, 24, 128), jnp.float32,  jnp.float32,  {"tile_bytes": 8192}),    # row tiling, non-dividing edge tile
        ((2, 7, 24),   jnp.float32,  jnp.float32,  {}),                      # fallback: feat % 128 != 0
        ((2, 16, 128), jnp.bfloat16, jnp.bfloat16, {}),                      # bf16 table cached at build time
    ]

    tables = {}
    for (B, S, D), xdt, pedt, kwargs in cases:
        tbl = tables.setdefault(
            (D, jnp.dtype(pedt).name),
            make_positional_encoding_table(D, max_len=64, dtype=pedt),
        )
        key, sub = jax.random.split(key)
        x = jax.random.normal(sub, (B, S, D), dtype=jnp.float32).astype(xdt)

        # Reference computed BEFORE the kernel call (donation-safe ordering).
        expected = (x + tbl[None, :S, :]).astype(xdt)

        out = jax.block_until_ready(positional_encoding(x, tbl, **kwargs))

        assert out.shape == (B, S, D), f"bad shape at {(B, S, D)}"
        assert out.dtype == jnp.dtype(xdt), f"bad dtype at {(B, S, D)}"
        atol = 1e-6 if jnp.dtype(xdt) == jnp.float32 else 5e-2
        assert jnp.allclose(out.astype(jnp.float32), expected.astype(jnp.float32),
                            atol=atol), f"mismatch vs reference at {(B, S, D, xdt, pedt)}"

    print("KERNEL_OK")
</pallas_src>

<mosaic_0001>
module attributes {stable_mosaic.version = 11 : i64} {
  func.func @_pe_add_kernel(%arg0: i32, %arg1: i32, %arg2: memref<2x1x256xf32, #tpu.memory_space<vmem>>, %arg3: memref<1x256xf32, #tpu.memory_space<vmem>>, %arg4: memref<2x1x256xf32, #tpu.memory_space<vmem>>) attributes {dimension_semantics = [#tpu.dimension_semantics<parallel>, #tpu.dimension_semantics<parallel>], iteration_bounds = array<i64: 1, 1>, scalar_prefetch = 0 : i64, scratch_operands = 0 : i64, tpu.core_type = #tpu.core_type<tc>, window_params = [{transform_indices = @transform_0, window_bounds = array<i64: 2, 1, 256>}, {transform_indices = @transform_1, window_bounds = array<i64: 1, 256>}, {transform_indices = @transform_2, window_bounds = array<i64: 2, 1, 256>}]} {
    %c0 = arith.constant 0 : index
    %c0_0 = arith.constant 0 : index
    %c0_1 = arith.constant 0 : index
    %0 = vector.load %arg2[%c0, %c0_0, %c0_1] : memref<2x1x256xf32, #tpu.memory_space<vmem>>, vector<2x1x256xf32>
    %c0_2 = arith.constant 0 : index
    %c0_3 = arith.constant 0 : index
    %1 = vector.load %arg3[%c0_2, %c0_3] : memref<1x256xf32, #tpu.memory_space<vmem>>, vector<1x256xf32>
    %2 = vector.shape_cast %1 : vector<1x256xf32> to vector<1x1x256xf32>
    %3 = vector.broadcast %2 : vector<1x1x256xf32> to vector<2x1x256xf32>
    %4 = arith.addf %0, %3 : vector<2x1x256xf32>
    %c0_4 = arith.constant 0 : index
    %c0_5 = arith.constant 0 : index
    %c0_6 = arith.constant 0 : index
    %5 = vector.load %arg4[%c0_4, %c0_5, %c0_6] : memref<2x1x256xf32, #tpu.memory_space<vmem>>, vector<2x1x256xf32>
    tpu.vector_store %arg4[%c0_4, %c0_5, %c0_6], %4 {strides = array<i32>} : memref<2x1x256xf32, #tpu.memory_space<vmem>>, vector<2x1x256xf32>,
    return
  }
  func.func @transform_0(%arg0: i32, %arg1: i32) -> (i32, i32, i32) {
    %c0_i32 = arith.constant 0 : i32
    %c0_i32_0 = arith.constant 0 : i32
    return %arg1, %arg0, %c0_i32 : i32, i32, i32
  }
  func.func @transform_1(%arg0: i32, %arg1: i32) -> (i32, i32) {
    %c0_i32 = arith.constant 0 : i32
    %c0_i32_0 = arith.constant 0 : i32
    return %arg0, %c0_i32 : i32, i32
  }
  func.func @transform_2(%arg0: i32, %arg1: i32) -> (i32, i32, i32) {
    %c0_i32 = arith.constant 0 : i32
    %c0_i32_0 = arith.constant 0 : i32
    return %arg1, %arg0, %c0_i32 : i32, i32, i32
  }
}

</mosaic_0001>

<bundles_post_ra>
// kernel: tpu_custom_call.1
= control target key start
LH: loop header
LB: loop body
LE: loop exit
PB: predicated region body
PF: predicated region fallthrough
CT: control target
= control target key end

     0   :  { %7 = vsyncpa [#allocation3], 0  ;;  %s158_s0 = inlined_call_operand.hbm [shape: f32[2,1,256], index: 0, kind: input, shape index: {}]   ;;  %s159_s1 = inlined_call_operand.vmem [shape: f32[1,256], index: 1, kind: input, shape index: {}]   ;;  %s160_s2 = inlined_call_operand.hbm [shape: f32[2,1,256], index: 2, kind: output, shape index: {}]  }
   0x1   :  { %8 = vsyncpa [#allocation4], 0  ;;  %s106_s9 = smov [#allocation2]   ;;  %s58_s13 = scalar_lea.hbm %s158_s0, 64 }
   0x2   :  { %s14_s10 = sshll.u32 %s106_s9, 4  ;;  %p59_p0 = scmp.ne.s32.totalorder %s158_s0, %s58_s13  ;;  %s15_s10 = int_to_ptr.vmem [resolvable:$true] %s14_s10 }
   0x3   :  { %p62_p1 = scmp.lt.u32.totalorder %s58_s13, %s158_s0 }
   0x5   :  { %p64_p2 = pnand %p62_p1, %p59_p0 }
   0x7   :  { %67 = shalt.err (!%p64_p2)
}
   0x8   :  { %s68_s18 = scalar_lea.vmem %s15_s10, 64  ;;  %p73_p4 = scmp.lt.s32.totalorder %s15_s10, %s15_s10 }
   0x9   :  { %p69_p3 = scmp.ne.s32.totalorder %s15_s10, %s68_s18  ;;  %p74_p5 = scmp.lt.s32.totalorder %s68_s18, %s68_s18 }
   0xb   :  { %p75_p6 = por %p74_p5, %p73_p4 }
   0xd   :  { %p76_p7 = pnand %p75_p6, %p69_p3 }
   0xf   :  { %79 = shalt.err (!%p76_p7)
}
  0x10   :  { %s107_s19 = smov 32   ;;  %s108_s20 = smov 2  }
  0x11   :  { %20 = dma.hbm_to_vmem [thread:$0]  %s158_s0, 64, %s15_s10, [#allocation3], %s107_s19, %s107_s19, %s108_s20  }
  0x12   :  { %102 = dma.done.wait [#allocation3], 64  }
  0x13   :  { %103 = vsyncadd [#allocation3], 4294967232  ;;  %v31_v0 = vlaneseq  ;;  %s109_s23 = smov [#allocation5]   ;;  %v26_v1 = vld [vmem:[#allocation2] sm:$0x3] }
  0x14   :  { %s42_s24 = sshll.u32 %s109_s23, 4  ;;  %v28_v2 = vld [vmem:[%s159_s1] sm:$0x3]  ;;  %v27_v3 = vld [vmem:[#allocation2 + $0x2] sm:$0x3]  ;;  %s43_s24 = int_to_ptr.vmem [resolvable:$true] %s42_s24 }
  0x15   :  { %vm33_vm0 = vcmp.lt.s32.totalorder %v31_v0, 256  ;;  %v29_v4 = vadd.f32 %v28_v2, %v26_v1  ;;  %v30_v5 = vadd.f32 %v28_v2, %v27_v3  ;;  %s80_s27 = scalar_lea.vmem %s43_s24, 64  ;;  %p85_p9 = scmp.lt.s32.totalorder %s43_s24, %s43_s24 }
  0x16   :  { %p81_p8 = scmp.ne.s32.totalorder %s43_s24, %s80_s27  ;;  %p86_p10 = scmp.lt.s32.totalorder %s80_s27, %s80_s27 }
  0x17   :  { %35 = vst.msk [vmem:[#allocation5] sm:$0x3] %vm33_vm0, %v29_v4  ;;  %36 = vst.msk [vmem:[#allocation5 + $0x2] sm:$0x3] %vm33_vm0, %v30_v5 }
  0x18   :  { %p87_p11 = por %p86_p10, %p85_p9 }
  0x1a   :  { %p88_p12 = pnand %p87_p11, %p81_p8 }
  0x1c   :  { %91 = shalt.err (!%p88_p12)
}
  0x1d   :  { %s92_s29 = scalar_lea.hbm %s160_s2, 64 }
  0x1e   :  { %p93_p13 = scmp.ne.s32.totalorder %s160_s2, %s92_s29  ;;  %p96_p0 = scmp.lt.u32.totalorder %s92_s29, %s160_s2 }
  0x20   :  { %p98_p1 = pnand %p96_p0, %p93_p13 }
  0x22   :  { %101 = shalt.err (!%p98_p1)
}
  0x23   :  { %48 = dma.vmem_to_hbm [thread:$0]  %s43_s24, 64, %s160_s2, [#allocation4], %s107_s19, %s107_s19, %s108_s20  }
  0x24   :  { %104 = dma.done.wait [#allocation4], 64  }
  0x25   :  { %105 = vsyncadd [#allocation4], 4294967232 }
  0x26   :  { %52 = vsyncpa [#allocation3], 1 }
  0x27   :  { %53 = vsyncpa [#allocation4], 1 }

</bundles_post_ra>
